<compile_context>
chip_gen: v7x
topology: tpu7x:2x2x1
jax: 0.10.0
libtpu: 0.0.40
codegen_flags: <defaults>
</compile_context>

<pallas_src>
import functools

import jax
import jax.numpy as jnp
from jax.experimental import pallas as pl
from jax.experimental.pallas import tpu as pltpu


def _round_up(x, m):
    return ((x + m - 1) // m) * m


def _round_down(x, m):
    return (x // m) * m


_VMEM_LIMIT = 48 * 1024 * 1024          # safe on v5e/v6e (128 MiB) and v7x (64 MiB)
_FUSED_BYTES_F32 = 6 * 1024 * 1024      # x (as f32) below this -> single fused kernel
_TILE_TARGET_BYTES = 2 * 1024 * 1024    # ~2 MiB x tiles in the tiled path


# ----------------------------- Pallas kernels --------------------------------
def _bn_stats_kernel(x_ref, gb_ref, ss_ref, sum_ref, sq_ref, *, tm, m_rows, eps):
    """Accumulate per-feature sum / sum-of-squares over row tiles; on the last
    tile fold them (with gamma/beta) into packed scale/shift."""
    i = pl.program_id(0)

    @pl.when(i == 0)
    def _():
        sum_ref[...] = jnp.zeros_like(sum_ref)
        sq_ref[...] = jnp.zeros_like(sq_ref)

    x = x_ref[...].astype(jnp.float32)
    if m_rows % tm != 0:
        # Ragged last tile: out-of-range rows hold undefined data -> mask them.
        rows = i * tm + jax.lax.broadcasted_iota(jnp.int32, (tm, 1), 0)
        x = jnp.where(rows < m_rows, x, 0.0)

    sum_ref[...] += jnp.sum(x, axis=0, keepdims=True)
    sq_ref[...] += jnp.sum(x * x, axis=0, keepdims=True)

    @pl.when(i == pl.num_programs(0) - 1)
    def _():
        inv_m = jnp.float32(1.0 / m_rows)
        mean = sum_ref[...] * inv_m
        # NOTE: E[x^2] - E[x]^2 form; can lose precision when |mean| >> std.
        var = jnp.maximum(sq_ref[...] * inv_m - mean * mean, 0.0)
        scale = gb_ref[0:1, :] * jax.lax.rsqrt(var + jnp.float32(eps))
        shift = gb_ref[1:2, :] - mean * scale
        ss_ref[0:1, :] = scale
        ss_ref[1:2, :] = shift


def _bn_apply_kernel(x_ref, ss_ref, o_ref):
    """y = x * scale + shift with packed (2, D) scale/shift, row-tiled."""
    x = x_ref[...].astype(jnp.float32)
    y = x * ss_ref[0:1, :] + ss_ref[1:2, :]
    o_ref[...] = y.astype(o_ref.dtype)


def _bn_fused_kernel(x_ref, gb_ref, o_ref, *, eps):
    """Whole-activation fused BN (x resident in VMEM): stats + normalize."""
    x = x_ref[...].astype(jnp.float32)
    mean = jnp.mean(x, axis=0, keepdims=True)
    var = jnp.mean(jnp.square(x - mean), axis=0, keepdims=True)  # two-pass variance
    scale = gb_ref[0:1, :] * jax.lax.rsqrt(var + jnp.float32(eps))
    shift = gb_ref[1:2, :] - mean * scale
    o_ref[...] = (x * scale + shift).astype(o_ref.dtype)


# ------------------------------ wrappers --------------------------------------
def _bn_stats_scale_shift(x2d, gb, *, tm, eps):
    """Returns packed (2, D) [scale; shift] from batch statistics of x2d."""
    M, D = x2d.shape
    n_tiles = (M + tm - 1) // tm
    kernel = functools.partial(_bn_stats_kernel, tm=tm, m_rows=M, eps=eps)
    return pl.pallas_call(
        kernel,
        out_shape=jax.ShapeDtypeStruct((2, D), jnp.float32),
        grid_spec=pltpu.PrefetchScalarGridSpec(
            num_scalar_prefetch=0,
            grid=(n_tiles,),
            in_specs=[pl.BlockSpec((tm, D), lambda i: (i, 0)),   # x row tile
                      pl.BlockSpec((2, D), lambda i: (0, 0))],   # packed gamma/beta
            out_specs=pl.BlockSpec((2, D), lambda i: (0, 0)),    # packed scale/shift
            scratch_shapes=[pltpu.VMEM((1, D), jnp.float32),
                            pltpu.VMEM((1, D), jnp.float32)],
        ),
        compiler_params=pltpu.CompilerParams(
            dimension_semantics=("arbitrary",),                  # reduction axis
            vmem_limit_bytes=_VMEM_LIMIT),
        cost_estimate=pl.CostEstimate(
            flops=3 * M * D, transcendentals=D,
            bytes_accessed=x2d.dtype.itemsize * M * D + 4 * 4 * D),
    )(x2d, gb)


def _bn_apply(x2d, ss, *, tm):
    """y = x * scale + shift, row-tiled; output keeps the caller's dtype."""
    M, D = x2d.shape
    n_tiles = (M + tm - 1) // tm
    return pl.pallas_call(
        _bn_apply_kernel,
        out_shape=jax.ShapeDtypeStruct((M, D), x2d.dtype),
        grid_spec=pltpu.PrefetchScalarGridSpec(
            num_scalar_prefetch=0,
            grid=(n_tiles,),
            in_specs=[pl.BlockSpec((tm, D), lambda i: (i, 0)),
                      pl.BlockSpec((2, D), lambda i: (0, 0))],
            out_specs=pl.BlockSpec((tm, D), lambda i: (i, 0)),
        ),
        compiler_params=pltpu.CompilerParams(
            dimension_semantics=("parallel",),                   # shards TCs on v7x
            vmem_limit_bytes=_VMEM_LIMIT),
        cost_estimate=pl.CostEstimate(
            flops=2 * M * D, transcendentals=0,
            bytes_accessed=2 * x2d.dtype.itemsize * M * D + 4 * 2 * D),
    )(x2d, ss)


def _bn_fused(x2d, gb, *, eps):
    """Single-pass BN for activations that fit in VMEM."""
    M, D = x2d.shape
    kernel = functools.partial(_bn_fused_kernel, eps=eps)
    return pl.pallas_call(
        kernel,
        out_shape=jax.ShapeDtypeStruct((M, D), x2d.dtype),
        grid_spec=pltpu.PrefetchScalarGridSpec(
            num_scalar_prefetch=0,
            grid=(1,),
            in_specs=[pl.BlockSpec((M, D), lambda i: (0, 0)),
                      pl.BlockSpec((2, D), lambda i: (0, 0))],
            out_specs=pl.BlockSpec((M, D), lambda i: (0, 0)),
        ),
        compiler_params=pltpu.CompilerParams(
            dimension_semantics=("arbitrary",),
            vmem_limit_bytes=_VMEM_LIMIT),
        cost_estimate=pl.CostEstimate(
            flops=7 * M * D, transcendentals=D,
            bytes_accessed=2 * x2d.dtype.itemsize * M * D + 4 * 2 * D),
    )(x2d, gb)


# ------------------------------- module ---------------------------------------
class LinearBatchNormPallas:
    """Pallas replica of LinearBatchNorm (BatchNorm1d-over-dim via BatchNorm2d)."""

    def __init__(self, dim, affine=True, eps=1e-5):
        self.dim = int(dim)
        self.affine = bool(affine)
        self.eps = float(eps)

        c = jnp.arange(self.dim, dtype=jnp.float32)
        if self.affine:
            # Deterministic, non-trivial affine params (exercise the affine path).
            self.gamma = 1.0 + 0.05 * c
            self.beta = 0.02 * c - 0.1
        else:
            self.gamma = jnp.ones((self.dim,), jnp.float32)
            self.beta = jnp.zeros((self.dim,), jnp.float32)
        # Running statistics (eval mode only).
        self.running_mean = 0.01 * c
        self.running_var = 1.0 + 0.1 * c

    def _tile_rows(self, M, D, itemsize):
        # ~2 MiB of x per grid step, multiple of 8; with double-buffered in+out
        # that is <= ~8-10 MiB live VMEM -> safe on v7x's 64 MiB as well.
        tm = max(8, _round_down(_TILE_TARGET_BYTES // max(1, D * itemsize), 8))
        return min(tm, _round_up(M, 8))

    def __call__(self, x, training=True):
        # Matches: x.view(-1, dim, 1, 1) -> BN2d -> x.view(-1, dim)
        x2d = jnp.asarray(x).reshape(-1, self.dim)   # keep caller dtype at HBM boundary
        M, D = x2d.shape
        gb = jnp.stack([self.gamma, self.beta], axis=0)          # (2, D) f32

        if training:
            if M * D * 4 <= _FUSED_BYTES_F32:
                # x fits in VMEM: one fused pass, x read from HBM exactly once.
                return _bn_fused(x2d, gb, eps=self.eps)
            tm = self._tile_rows(M, D, x2d.dtype.itemsize)
            ss = _bn_stats_scale_shift(x2d, gb, tm=tm, eps=self.eps)
            return _bn_apply(x2d, ss, tm=tm)

        # Eval: fold running statistics into scale/shift (tiny D-element XLA op).
        scale = self.gamma * jax.lax.rsqrt(self.running_var + self.eps)
        shift = self.beta - self.running_mean * scale
        ss = jnp.stack([scale, shift], axis=0)
        tm = self._tile_rows(M, D, x2d.dtype.itemsize)
        return _bn_apply(x2d, ss, tm=tm)


# ------------------------------ reference -------------------------------------
def _reference(mod, x, training=True):
    x2d = jnp.asarray(x, jnp.float32).reshape(-1, mod.dim)
    if training:
        mean = jnp.mean(x2d, axis=0)
        var = jnp.mean(jnp.square(x2d - mean), axis=0)   # biased variance
    else:
        mean, var = mod.running_mean, mod.running_var
    y = (x2d - mean) / jnp.sqrt(var + mod.eps)
    return y * mod.gamma + mod.beta


if __name__ == "__main__":
    key = jax.random.PRNGKey(0)
    dim = 32
    x = jax.random.normal(key, (8, dim), dtype=jnp.float32)   # (seq=8, hidden=32)

    mod = LinearBatchNormPallas(dim=dim, affine=True)

    # 1) Training-mode forward (batch statistics) — fused single-kernel path.
    out_train = jax.block_until_ready(mod(x, training=True))
    ref_train = _reference(mod, x, training=True)
    assert out_train.shape == (8, dim), out_train.shape
    assert jnp.allclose(out_train, ref_train, atol=1e-4, rtol=1e-4), \
        float(jnp.max(jnp.abs(out_train - ref_train)))

    # 2) Eval-mode forward (running statistics folded into scale/shift).
    out_eval = jax.block_until_ready(mod(x, training=False))
    ref_eval = _reference(mod, x, training=False)
    assert jnp.allclose(out_eval, ref_eval, atol=1e-4, rtol=1e-4), \
        float(jnp.max(jnp.abs(out_eval - ref_eval)))

    # 3) Exercise the tiled (large-activation) path explicitly with a small
    #    shape and a ragged last row tile (200 = 3*64 + 8): stats + apply.
    mod2 = LinearBatchNormPallas(dim=128, affine=True)
    x2 = jax.random.normal(jax.random.PRNGKey(1), (200, 128), dtype=jnp.float32)
    gb2 = jnp.stack([mod2.gamma, mod2.beta], axis=0)
    ss2 = _bn_stats_scale_shift(x2, gb2, tm=64, eps=mod2.eps)
    out2 = jax.block_until_ready(_bn_apply(x2, ss2, tm=64))
    ref2 = _reference(mod2, x2, training=True)
    assert jnp.allclose(out2, ref2, atol=1e-3, rtol=1e-3), \
        float(jnp.max(jnp.abs(out2 - ref2)))

    # 4) bf16 I/O smoke test (caller dtype preserved, f32 accumulation in-kernel).
    out_bf = jax.block_until_ready(mod(x.astype(jnp.bfloat16), training=True))
    assert out_bf.dtype == jnp.bfloat16
    assert jnp.allclose(out_bf.astype(jnp.float32), ref_train, atol=5e-2, rtol=5e-2)

    print("KERNEL_OK")
</pallas_src>

<mosaic_0001>
module attributes {stable_mosaic.version = 11 : i64} {
  func.func @_bn_fused_kernel(%arg0: i32, %arg1: memref<8x32xf32, #tpu.memory_space<vmem>>, %arg2: memref<2x32xf32, #tpu.memory_space<vmem>>, %arg3: memref<8x32xf32, #tpu.memory_space<vmem>>) attributes {dimension_semantics = [#tpu.dimension_semantics<arbitrary>], iteration_bounds = array<i64: 1>, scalar_prefetch = 0 : i64, scratch_operands = 0 : i64, tpu.core_type = #tpu.core_type<tc>, window_params = [{pipeline_mode = #tpu.pipeline_mode<synchronous>, transform_indices = @transform_0, window_bounds = array<i64: 8, 32>}, {pipeline_mode = #tpu.pipeline_mode<synchronous>, transform_indices = @transform_1, window_bounds = array<i64: 2, 32>}, {pipeline_mode = #tpu.pipeline_mode<synchronous>, transform_indices = @transform_2, window_bounds = array<i64: 8, 32>}]} {
    %c0 = arith.constant 0 : index
    %c0_0 = arith.constant 0 : index
    %0 = vector.load %arg1[%c0, %c0_0] : memref<8x32xf32, #tpu.memory_space<vmem>>, vector<8x32xf32>
    %cst = arith.constant dense<0.000000e+00> : vector<32xf32>
    %1 = vector.multi_reduction <add>, %0, %cst [0] : vector<8x32xf32> to vector<32xf32>
    %2 = vector.shape_cast %1 : vector<32xf32> to vector<1x32xf32>
    %cst_1 = arith.constant 8.000000e+00 : f32
    %3 = vector.broadcast %cst_1 : f32 to vector<1x32xf32>
    %4 = arith.divf %2, %3 : vector<1x32xf32>
    %5 = vector.broadcast %4 : vector<1x32xf32> to vector<8x32xf32>
    %6 = arith.subf %0, %5 : vector<8x32xf32>
    %7 = arith.mulf %6, %6 : vector<8x32xf32>
    %cst_2 = arith.constant dense<0.000000e+00> : vector<32xf32>
    %8 = vector.multi_reduction <add>, %7, %cst_2 [0] : vector<8x32xf32> to vector<32xf32>
    %9 = vector.shape_cast %8 : vector<32xf32> to vector<1x32xf32>
    %cst_3 = arith.constant 8.000000e+00 : f32
    %10 = vector.broadcast %cst_3 : f32 to vector<1x32xf32>
    %11 = arith.divf %9, %10 : vector<1x32xf32>
    %c0_4 = arith.constant 0 : index
    %c0_5 = arith.constant 0 : index
    %12 = vector.load %arg2[%c0_4, %c0_5] : memref<2x32xf32, #tpu.memory_space<vmem>>, vector<1x32xf32>
    %cst_6 = arith.constant 9.99999974E-6 : f32
    %13 = vector.broadcast %cst_6 : f32 to vector<1x32xf32>
    %14 = arith.addf %11, %13 : vector<1x32xf32>
    %15 = math.rsqrt %14 : vector<1x32xf32>
    %16 = arith.mulf %12, %15 : vector<1x32xf32>
    %c1 = arith.constant 1 : index
    %c0_7 = arith.constant 0 : index
    %17 = vector.load %arg2[%c1, %c0_7] : memref<2x32xf32, #tpu.memory_space<vmem>>, vector<1x32xf32>
    %18 = arith.mulf %4, %16 : vector<1x32xf32>
    %19 = arith.subf %17, %18 : vector<1x32xf32>
    %20 = vector.broadcast %16 : vector<1x32xf32> to vector<8x32xf32>
    %21 = arith.mulf %0, %20 : vector<8x32xf32>
    %22 = vector.broadcast %19 : vector<1x32xf32> to vector<8x32xf32>
    %23 = arith.addf %21, %22 : vector<8x32xf32>
    %c0_8 = arith.constant 0 : index
    %c0_9 = arith.constant 0 : index
    %24 = vector.load %arg3[%c0_8, %c0_9] : memref<8x32xf32, #tpu.memory_space<vmem>>, vector<8x32xf32>
    tpu.vector_store %arg3[%c0_8, %c0_9], %23 {strides = array<i32>} : memref<8x32xf32, #tpu.memory_space<vmem>>, vector<8x32xf32>,
    return
  }
  func.func @transform_0(%arg0: i32) -> (i32, i32) {
    %c0_i32 = arith.constant 0 : i32
    %c0_i32_0 = arith.constant 0 : i32
    %c0_i32_1 = arith.constant 0 : i32
    return %c0_i32, %c0_i32_0 : i32, i32
  }
  func.func @transform_1(%arg0: i32) -> (i32, i32) {
    %c0_i32 = arith.constant 0 : i32
    %c0_i32_0 = arith.constant 0 : i32
    %c0_i32_1 = arith.constant 0 : i32
    return %c0_i32, %c0_i32_0 : i32, i32
  }
  func.func @transform_2(%arg0: i32) -> (i32, i32) {
    %c0_i32 = arith.constant 0 : i32
    %c0_i32_0 = arith.constant 0 : i32
    %c0_i32_1 = arith.constant 0 : i32
    return %c0_i32, %c0_i32_0 : i32, i32
  }
}

</mosaic_0001>

<bundles_post_ra>
// kernel: tpu_custom_call.1
= control target key start
LH: loop header
LB: loop body
LE: loop exit
PB: predicated region body
PF: predicated region fallthrough
CT: control target
= control target key end

     0   :  { %7 = vsyncpa [#allocation3], 0  ;;  %s180_s0 = inlined_call_operand.hbm [shape: f32[8,32], index: 0, kind: input, shape index: {}]   ;;  %s181_s1 = inlined_call_operand.vmem [shape: f32[2,32], index: 1, kind: input, shape index: {}]   ;;  %s182_s2 = inlined_call_operand.hbm [shape: f32[8,32], index: 2, kind: output, shape index: {}]  }
   0x1   :  { %8 = vsyncpa [#allocation4], 0  ;;  %s130_s9 = smov [#allocation2]   ;;  %s82_s13 = scalar_lea.hbm %s180_s0, 128 }
   0x2   :  { %s15_s10 = sshll.u32 %s130_s9, 4  ;;  %p83_p0 = scmp.ne.s32.totalorder %s180_s0, %s82_s13  ;;  %s16_s10 = int_to_ptr.vmem [resolvable:$true] %s15_s10 }
   0x3   :  { %p86_p1 = scmp.lt.u32.totalorder %s82_s13, %s180_s0 }
   0x5   :  { %p88_p2 = pnand %p86_p1, %p83_p0 }
   0x7   :  { %91 = shalt.err (!%p88_p2)
}
   0x8   :  { %s92_s18 = scalar_lea.vmem %s16_s10, 128  ;;  %p97_p4 = scmp.lt.s32.totalorder %s16_s10, %s16_s10 }
   0x9   :  { %p93_p3 = scmp.ne.s32.totalorder %s16_s10, %s92_s18  ;;  %p98_p5 = scmp.lt.s32.totalorder %s92_s18, %s92_s18 }
   0xb   :  { %p99_p6 = por %p98_p5, %p97_p4 }
   0xd   :  { %p100_p7 = pnand %p99_p6, %p93_p3 }
   0xf   :  { %103 = shalt.err (!%p100_p7)
}
  0x10   :  { %18 = dma.hbm_to_vmem [thread:$0]  %s180_s0, 128, %s16_s10, [#allocation3]  }
  0x11   :  { %126 = dma.done.wait [#allocation3], 128  }
  0x12   :  { %127 = vsyncadd [#allocation3], 4294967168  ;;  %vm25_vm0 = vcmask 261120   ;;  %v24_v0 = vld [vmem:[#allocation2] sm:$0xff]  ;;  %v52_v20 = vlaneseq  ;;  %s131_s24 = smov [#allocation5]  }
  0x13   :  { %v26_v1 = vsel %vm25_vm0, %v24_v0, 0.0  ;;  %v45_v22 = vld [vmem:[%s181_s1] sm:$0x1]  ;;  %v49_v26 = vld [vmem:[%s181_s1 + $0x1] sm:$0x1]  ;;  %s69_s25 = sshll.u32 %s131_s24, 4  ;;  %s70_s25 = int_to_ptr.vmem [resolvable:$true] %s69_s25 }
  0x14   :  { %v27_v2 = vrot.slane %v26_v1, 4  ;;  %v53_v21 = vshrl.u32 %v52_v20, 7  ;;  %s104_s26 = scalar_lea.vmem %s70_s25, 128  ;;  %p109_p9 = scmp.lt.s32.totalorder %s70_s25, %s70_s25 }
  0x15   :  { %p105_p8 = scmp.ne.s32.totalorder %s70_s25, %s104_s26  ;;  %p110_p10 = scmp.lt.s32.totalorder %s104_s26, %s104_s26 }
  0x16   :  { %v28_v3 = vadd.f32 %v27_v2, %v26_v1  ;;  %v54_v23 = vsub.s32 0, %v53_v21 }
  0x17   :  { %p111_p11 = por %p110_p10, %p109_p9 }
  0x18   :  { %v29_v4 = vrot.slane %v28_v3, 2 }
  0x19   :  { %p112_p12 = pnand %p111_p11, %p105_p8 }
  0x1a   :  { %v30_v5 = vadd.f32 %v29_v4, %v28_v3 }
  0x1c   :  { %v31_v6 = vrot.slane %v30_v5, 1 }
  0x1e   :  { %v32_v7 = vadd.f32 %v31_v6, %v30_v5 }
  0x20   :  { %v34_v8 = vmul.f32 0.125, %v32_v7 }
  0x22   :  { %v35_v9 = vsub.f32 %v24_v0, %v34_v8 }
  0x24   :  { %v36_v10 = vmul.f32 %v35_v9, %v35_v9 }
  0x26   :  { %v37_v11 = vsel %vm25_vm0, %v36_v10, 0.0 }
  0x27   :  { %v38_v12 = vrot.slane %v37_v11, 4 }
  0x29   :  { %v39_v13 = vadd.f32 %v38_v12, %v37_v11 }
  0x2b   :  { %v40_v14 = vrot.slane %v39_v13, 2 }
  0x2d   :  { %v41_v15 = vadd.f32 %v40_v14, %v39_v13 }
  0x2f   :  { %v42_v16 = vrot.slane %v41_v15, 1 }
  0x31   :  { %v43_v17 = vadd.f32 %v42_v16, %v41_v15 }
  0x33   :  { %v44_v18 = vmul.f32 0.125, %v43_v17 }
  0x35   :  { %v46_v19 = vadd.f32 1e-05, %v44_v18 }
  0x37   :  { %80 = vrsqrt.f32 %v46_v19 }
  0x41   :  { %v81_v24 = vpop.eup %80 }
  0x42   :  { %v48_v25 = vmul.f32 %v81_v24, %v45_v22 }
  0x44   :  { %v50_v27 = vmul.f32 %v48_v25, %v34_v8  ;;  %v55_v28 = vrot.slane %v48_v25, %v54_v23 }
  0x46   :  { %v51_v29 = vsub.f32 %v49_v26, %v50_v27  ;;  %v56_v30 = vmul.f32 %v55_v28, %v24_v0 }
  0x48   :  { %v60_v31 = vrot.slane %v51_v29, %v54_v23 }
  0x4a   :  { %v61_v32 = vadd.f32 %v60_v31, %v56_v30 }
  0x4c   :  { %62 = vst.msk [vmem:[#allocation5] sm:$0xff] %vm25_vm0, %v61_v32 }
  0x4d   :  { %115 = shalt.err (!%p112_p12)
}
  0x4e   :  { %s116_s28 = scalar_lea.hbm %s182_s2, 128 }
  0x4f   :  { %p117_p13 = scmp.ne.s32.totalorder %s182_s2, %s116_s28  ;;  %p120_p0 = scmp.lt.u32.totalorder %s116_s28, %s182_s2 }
  0x51   :  { %p122_p1 = pnand %p120_p0, %p117_p13 }
  0x53   :  { %125 = shalt.err (!%p122_p1)
}
  0x54   :  { %72 = dma.vmem_to_hbm [thread:$0]  %s70_s25, 128, %s182_s2, [#allocation4]  }
  0x55   :  { %128 = dma.done.wait [#allocation4], 128  }
  0x56   :  { %129 = vsyncadd [#allocation4], 4294967168 }
  0x57   :  { %76 = vsyncpa [#allocation3], 1 }
  0x58   :  { %77 = vsyncpa [#allocation4], 1 }

</bundles_post_ra>
